<compile_context>
chip_gen: v7x
topology: tpu7x:2x2x1
jax: 0.10.0
libtpu: 0.0.40
codegen_flags: <defaults>
</compile_context>

<pallas_src>
import functools

import jax
import jax.numpy as jnp
from jax import lax
from jax.experimental import pallas as pl
from jax.experimental.pallas import tpu as pltpu


def _attention_kernel(q_ref, k_ref, v_ref, mask_ref, ctx_ref, attn_ref):
    q = q_ref[...]                      # (Bn, 1, H)   native dtype
    k = k_ref[...]                      # (Bn, T, H)   native dtype
    v = v_ref[...]                      # (Bn, T, V)   native dtype
    mb = mask_ref[...]                  # (Bn, 1, T)   f32: 0 valid, -1e9 masked

    # energy[b, 0, t] = sum_h q[b, 0, h] * k[b, t, h]  -- batched MXU matmul.
    energy = jnp.einsum(
        "bqh,bth->bqt", q, k,
        preferred_element_type=jnp.float32,
        precision=lax.Precision.HIGHEST)                      # (Bn, 1, T) f32

    # masked_fill(arange(T) >= lens, -1e9): select the bias where it is set.
    energy = jnp.where(mb < 0.0, mb, energy)

    # Softmax over the time axis (lane axis).  Exact divide (no approx recip).
    m = jnp.max(energy, axis=-1, keepdims=True)
    p = jnp.exp(energy - m)
    denom = jnp.sum(p, axis=-1, keepdims=True)
    attn = p / denom                                          # (Bn, 1, T) f32

    # context[b, 0, v] = sum_t attn[b, 0, t] * value[b, t, v]  -- MXU matmul.
    context = jnp.einsum(
        "bqt,btv->bqv", attn.astype(v.dtype), v,
        preferred_element_type=jnp.float32,
        precision=lax.Precision.HIGHEST)                      # (Bn, 1, V) f32

    ctx_ref[...] = context.astype(ctx_ref.dtype)
    attn_ref[...] = attn.astype(attn_ref.dtype)


def _vmem_capacity_bytes():
    try:
        return int(pltpu.get_tpu_info().vmem_capacity_bytes)
    except Exception:
        return 64 * 1024 * 1024  # conservative (v7x per-TC) fallback


def _pick_block_n(n, per_row_bytes, vmem_capacity):
    # Spend about half of physical VMEM on the pipeline; the rest is headroom
    # for regalloc / compiler temporaries.
    budget = max(8 << 20, vmem_capacity // 2)
    bn = budget // max(per_row_bytes, 1)
    bn = max(8, min(1024, (bn // 8) * 8))
    if bn >= n:
        return n                       # one block covers the whole batch
    # Prefer a multiple of 8 that divides N exactly -> no ragged tail block.
    for cand in range(bn, 7, -8):
        if n % cand == 0:
            return cand
    return bn                          # ragged tail: partial last block


@functools.partial(jax.jit, static_argnames=("block_n",))
def attention(query, key, value, lens, *, block_n=None):
    """query (N,H), key (N,T,H), value (N,T,V), lens (N,) int ->
    (context (N,V), attention (N,T))."""
    n, t, h = key.shape
    v_dim = value.shape[-1]

    out_dtype = jnp.promote_types(jnp.promote_types(query.dtype, key.dtype),
                                  value.dtype)

    qb = query.dtype.itemsize
    kb = key.dtype.itemsize
    vb = value.dtype.itemsize
    ob = jnp.dtype(out_dtype).itemsize

    # Per-batch-row VMEM footprint.  (Bn,1,*) tiles pad the unit sublane dim
    # to 8; key/value tiles dominate.  Double-buffered I/O + f32 temporaries
    # (energy, p, attn, context) from the compute.
    io_row = (t * h * kb + t * v_dim * vb          # key / value tiles
              + 8 * h * qb + 8 * t * 4             # query tile, mask tile
              + 8 * t * ob + 8 * v_dim * ob)       # attn / context out tiles
    tmp_row = 4 * 8 * (3 * t + v_dim)              # f32 softmax/ctx temporaries
    per_row = 2 * io_row + tmp_row

    vmem_cap = _vmem_capacity_bytes()
    if block_n is None:
        block_n = int(_pick_block_n(n, per_row, vmem_cap))
    block_n = max(1, min(int(block_n), n))

    # Scoped VMEM limit: pipeline bytes (already double-buffered in per_row)
    # plus headroom, capped below physical capacity.
    needed = block_n * per_row + (8 << 20)
    vmem_limit = int(min(max(needed, 32 << 20),
                         max(vmem_cap - (8 << 20), 24 << 20)))

    # Reshapes below are free XLA metadata ops (no data movement):
    q3 = query.reshape(n, 1, h)
    # Length mask folded into a tiny f32 bias (0 valid, -1e9 masked); this is
    # N*T*4 bytes of extra HBM traffic (<1% of the key/value stream) and lets
    # the kernel stay purely rank-3 with no in-kernel iota/int compare.
    lens_i = lens.astype(jnp.int32)
    t_idx = jnp.arange(t, dtype=jnp.int32)
    mask_bias = jnp.where(t_idx[None, :] >= lens_i[:, None],
                          jnp.float32(-1000000000.0),
                          jnp.float32(0.0)).reshape(n, 1, t)

    grid = (pl.cdiv(n, block_n),)

    cost = pl.CostEstimate(
        flops=2 * n * t * (h + v_dim),
        transcendentals=n * t,
        bytes_accessed=(n * h * qb + n * t * h * kb + n * t * v_dim * vb
                        + n * t * 4 + n * v_dim * ob + n * t * ob),
    )

    grid_spec = pltpu.PrefetchScalarGridSpec(
        num_scalar_prefetch=0,
        grid=grid,
        in_specs=[
            pl.BlockSpec((block_n, 1, h), lambda b: (b, 0, 0)),
            pl.BlockSpec((block_n, t, h), lambda b: (b, 0, 0)),
            pl.BlockSpec((block_n, t, v_dim), lambda b: (b, 0, 0)),
            pl.BlockSpec((block_n, 1, t), lambda b: (b, 0, 0)),
        ],
        out_specs=[
            pl.BlockSpec((block_n, 1, v_dim), lambda b: (b, 0, 0)),
            pl.BlockSpec((block_n, 1, t), lambda b: (b, 0, 0)),
        ],
    )

    context3, attn3 = pl.pallas_call(
        _attention_kernel,
        grid_spec=grid_spec,
        out_shape=(
            jax.ShapeDtypeStruct((n, 1, v_dim), out_dtype),
            jax.ShapeDtypeStruct((n, 1, t), out_dtype),
        ),
        compiler_params=pltpu.CompilerParams(
            # Batch axis is independent -> shard across TensorCores where
            # available (v7x has 2 TCs; harmless on v5e/v6e).
            dimension_semantics=("parallel",),
            vmem_limit_bytes=vmem_limit,
        ),
        cost_estimate=cost,
    )(q3, key, value, mask_bias)

    return context3.reshape(n, v_dim), attn3.reshape(n, t)


def _reference(query, key, value, lens):
    # Pure-JAX reference mirroring the PyTorch forward.
    n, t, h = key.shape
    energy = jnp.einsum("nth,nh->nt", key, query)
    mask = jnp.arange(t)[None, :] >= lens[:, None]
    energy = jnp.where(mask, -1000000000.0, energy)
    attn = jax.nn.softmax(energy, axis=1)
    context = jnp.einsum("nt,ntv->nv", attn, value)
    return context, attn


if __name__ == "__main__":
    N, T, H, V = 2, 8, 32, 32
    rng = jax.random.PRNGKey(0)
    k1, k2, k3 = jax.random.split(rng, 3)

    query = jax.random.normal(k1, (N, H), dtype=jnp.float32)
    key = jax.random.normal(k2, (N, T, H), dtype=jnp.float32)
    value = jax.random.normal(k3, (N, T, V), dtype=jnp.float32)
    lens = jnp.array([5, 8], dtype=jnp.int32)

    context, attn = attention(query, key, value, lens)
    jax.block_until_ready((context, attn))

    ref_ctx, ref_attn = _reference(query, key, value, lens)
    assert jnp.allclose(context, ref_ctx, atol=1e-4, rtol=1e-4), (
        float(jnp.max(jnp.abs(context - ref_ctx))))
    assert jnp.allclose(attn, ref_attn, atol=1e-4, rtol=1e-4), (
        float(jnp.max(jnp.abs(attn - ref_attn))))

    print("KERNEL_OK")
</pallas_src>

<mosaic_0001>
module attributes {stable_mosaic.version = 11 : i64} {
  func.func @_attention_kernel(%arg0: i32, %arg1: memref<2x1x32xf32, #tpu.memory_space<vmem>>, %arg2: memref<2x8x32xf32, #tpu.memory_space<vmem>>, %arg3: memref<2x8x32xf32, #tpu.memory_space<vmem>>, %arg4: memref<2x1x8xf32, #tpu.memory_space<vmem>>, %arg5: memref<2x1x32xf32, #tpu.memory_space<vmem>>, %arg6: memref<2x1x8xf32, #tpu.memory_space<vmem>>) attributes {dimension_semantics = [#tpu.dimension_semantics<parallel>], iteration_bounds = array<i64: 1>, scalar_prefetch = 0 : i64, scratch_operands = 0 : i64, tpu.core_type = #tpu.core_type<tc>, window_params = [{transform_indices = @transform_0, window_bounds = array<i64: 2, 1, 32>}, {transform_indices = @transform_1, window_bounds = array<i64: 2, 8, 32>}, {transform_indices = @transform_2, window_bounds = array<i64: 2, 8, 32>}, {transform_indices = @transform_3, window_bounds = array<i64: 2, 1, 8>}, {transform_indices = @transform_4, window_bounds = array<i64: 2, 1, 32>}, {transform_indices = @transform_5, window_bounds = array<i64: 2, 1, 8>}]} {
    %c0 = arith.constant 0 : index
    %c0_0 = arith.constant 0 : index
    %c0_1 = arith.constant 0 : index
    %0 = vector.load %arg1[%c0, %c0_0, %c0_1] : memref<2x1x32xf32, #tpu.memory_space<vmem>>, vector<2x1x32xf32>
    %c0_2 = arith.constant 0 : index
    %c0_3 = arith.constant 0 : index
    %c0_4 = arith.constant 0 : index
    %1 = vector.load %arg2[%c0_2, %c0_3, %c0_4] : memref<2x8x32xf32, #tpu.memory_space<vmem>>, vector<2x8x32xf32>
    %c0_5 = arith.constant 0 : index
    %c0_6 = arith.constant 0 : index
    %c0_7 = arith.constant 0 : index
    %2 = vector.load %arg3[%c0_5, %c0_6, %c0_7] : memref<2x8x32xf32, #tpu.memory_space<vmem>>, vector<2x8x32xf32>
    %c0_8 = arith.constant 0 : index
    %c0_9 = arith.constant 0 : index
    %c0_10 = arith.constant 0 : index
    %3 = vector.load %arg4[%c0_8, %c0_9, %c0_10] : memref<2x1x8xf32, #tpu.memory_space<vmem>>, vector<2x1x8xf32>
    "tpu.trace_start"() <{level = 10 : i32, message = "bqh,bth->bqt"}> : () -> ()
    %cst = arith.constant dense<0.000000e+00> : vector<2x1x8xf32>
    %4 = tpu.matmul %0, %1, %cst {dimension_numbers = #tpu.dot_dimension_numbers<[2], [2], [1], [1], [0, 0, 0, 1, 1, 1], [0], [0]>, precision = #tpu.contract_precision<fp32>} : vector<2x1x32xf32>, vector<2x8x32xf32>, vector<2x1x8xf32> -> vector<2x1x8xf32>
    %cst_11 = arith.constant 0.000000e+00 : f32
    "tpu.trace_stop"() : () -> ()
    %5 = vector.broadcast %cst_11 : f32 to vector<2x1x8xf32>
    %6 = arith.cmpf olt, %3, %5 : vector<2x1x8xf32>
    %7 = arith.select %6, %3, %4 : vector<2x1x8xi1>, vector<2x1x8xf32>
    %cst_12 = arith.constant dense<0xFF800000> : vector<2x1xf32>
    %8 = vector.multi_reduction <maximumf>, %7, %cst_12 [2] : vector<2x1x8xf32> to vector<2x1xf32>
    %9 = vector.shape_cast %8 : vector<2x1xf32> to vector<2x1x1xf32>
    %10 = vector.broadcast %9 : vector<2x1x1xf32> to vector<2x1x8xf32>
    %11 = arith.subf %7, %10 : vector<2x1x8xf32>
    %12 = math.exp %11 : vector<2x1x8xf32>
    %cst_13 = arith.constant dense<0.000000e+00> : vector<2x1xf32>
    %13 = vector.multi_reduction <add>, %12, %cst_13 [2] : vector<2x1x8xf32> to vector<2x1xf32>
    %14 = vector.shape_cast %13 : vector<2x1xf32> to vector<2x1x1xf32>
    %15 = vector.broadcast %14 : vector<2x1x1xf32> to vector<2x1x8xf32>
    %16 = arith.divf %12, %15 : vector<2x1x8xf32>
    "tpu.trace_start"() <{level = 10 : i32, message = "bqt,btv->bqv"}> : () -> ()
    %cst_14 = arith.constant dense<0.000000e+00> : vector<2x1x32xf32>
    %17 = tpu.matmul %16, %2, %cst_14 {dimension_numbers = #tpu.dot_dimension_numbers<[2], [1], [1], [2], [0, 0, 0, 1, 1, 2], [0], [0]>, precision = #tpu.contract_precision<fp32>} : vector<2x1x8xf32>, vector<2x8x32xf32>, vector<2x1x32xf32> -> vector<2x1x32xf32>
    "tpu.trace_stop"() : () -> ()
    %c0_15 = arith.constant 0 : index
    %c0_16 = arith.constant 0 : index
    %c0_17 = arith.constant 0 : index
    %18 = vector.load %arg5[%c0_15, %c0_16, %c0_17] : memref<2x1x32xf32, #tpu.memory_space<vmem>>, vector<2x1x32xf32>
    tpu.vector_store %arg5[%c0_15, %c0_16, %c0_17], %17 {strides = array<i32>} : memref<2x1x32xf32, #tpu.memory_space<vmem>>, vector<2x1x32xf32>,
    %c0_18 = arith.constant 0 : index
    %c0_19 = arith.constant 0 : index
    %c0_20 = arith.constant 0 : index
    %19 = vector.load %arg6[%c0_18, %c0_19, %c0_20] : memref<2x1x8xf32, #tpu.memory_space<vmem>>, vector<2x1x8xf32>
    tpu.vector_store %arg6[%c0_18, %c0_19, %c0_20], %16 {strides = array<i32>} : memref<2x1x8xf32, #tpu.memory_space<vmem>>, vector<2x1x8xf32>,
    return
  }
  func.func @transform_0(%arg0: i32) -> (i32, i32, i32) {
    %c0_i32 = arith.constant 0 : i32
    %c0_i32_0 = arith.constant 0 : i32
    %c0_i32_1 = arith.constant 0 : i32
    return %arg0, %c0_i32, %c0_i32_0 : i32, i32, i32
  }
  func.func @transform_1(%arg0: i32) -> (i32, i32, i32) {
    %c0_i32 = arith.constant 0 : i32
    %c0_i32_0 = arith.constant 0 : i32
    %c0_i32_1 = arith.constant 0 : i32
    return %arg0, %c0_i32, %c0_i32_0 : i32, i32, i32
  }
  func.func @transform_2(%arg0: i32) -> (i32, i32, i32) {
    %c0_i32 = arith.constant 0 : i32
    %c0_i32_0 = arith.constant 0 : i32
    %c0_i32_1 = arith.constant 0 : i32
    return %arg0, %c0_i32, %c0_i32_0 : i32, i32, i32
  }
  func.func @transform_3(%arg0: i32) -> (i32, i32, i32) {
    %c0_i32 = arith.constant 0 : i32
    %c0_i32_0 = arith.constant 0 : i32
    %c0_i32_1 = arith.constant 0 : i32
    return %arg0, %c0_i32, %c0_i32_0 : i32, i32, i32
  }
  func.func @transform_4(%arg0: i32) -> (i32, i32, i32) {
    %c0_i32 = arith.constant 0 : i32
    %c0_i32_0 = arith.constant 0 : i32
    %c0_i32_1 = arith.constant 0 : i32
    return %arg0, %c0_i32, %c0_i32_0 : i32, i32, i32
  }
  func.func @transform_5(%arg0: i32) -> (i32, i32, i32) {
    %c0_i32 = arith.constant 0 : i32
    %c0_i32_0 = arith.constant 0 : i32
    %c0_i32_1 = arith.constant 0 : i32
    return %arg0, %c0_i32, %c0_i32_0 : i32, i32, i32
  }
}

</mosaic_0001>

<bundles_post_ra>
// kernel: attention.1
= control target key start
LH: loop header
LB: loop body
LE: loop exit
PB: predicated region body
PF: predicated region fallthrough
CT: control target
= control target key end

     0   :  { %11 = vsyncpa [#allocation3], 0  ;;  %s2439_s0 = inlined_call_operand.vmem [shape: f32[2,1,32], index: 0, kind: input, shape index: {}]   ;;  %s2440_s1 = inlined_call_operand.hbm [shape: f32[2,8,32], index: 1, kind: input, shape index: {}]   ;;  %s2441_s2 = inlined_call_operand.hbm [shape: f32[2,8,32], index: 2, kind: input, shape index: {}]   ;;  %s2442_s3 = inlined_call_operand.vmem [shape: f32[2,1,8], index: 3, kind: input, shape index: {}]   ;;  %s2443_s4 = inlined_call_operand.hbm [shape: f32[2,1,32], index: 4, kind: output, shape index: {0}]   ;;  %s2444_s5 = inlined_call_operand.hbm [shape: f32[2,1,8], index: 5, kind: output, shape index: {1}]  }
   0x1   :  { %12 = vsyncpa [#allocation6], 0 }
   0x2   :  { %13 = vsyncpa [#allocation4], 0 }
   0x3   :  { %14 = vsyncpa [#allocation9], 0  ;;  %s2249_s18 = smov [#allocation2]   ;;  %s2153_s22 = scalar_lea.hbm %s2440_s1, 256 }
   0x4   :  { %s22_s19 = sshll.u32 %s2249_s18, 4  ;;  %p2154_p0 = scmp.ne.s32.totalorder %s2440_s1, %s2153_s22  ;;  %s23_s19 = int_to_ptr.vmem [resolvable:$true] %s22_s19 }
   0x5   :  { %p2157_p1 = scmp.lt.u32.totalorder %s2153_s22, %s2440_s1 }
   0x7   :  { %p2159_p2 = pnand %p2157_p1, %p2154_p0 }
   0x9   :  { %2162 = shalt.err (!%p2159_p2)
}
   0xa   :  { %s2163_s27 = scalar_lea.vmem %s23_s19, 256  ;;  %p2168_p4 = scmp.lt.s32.totalorder %s23_s19, %s23_s19 }
   0xb   :  { %p2164_p3 = scmp.ne.s32.totalorder %s23_s19, %s2163_s27  ;;  %p2169_p5 = scmp.lt.s32.totalorder %s2163_s27, %s2163_s27 }
   0xd   :  { %p2170_p6 = por %p2169_p5, %p2168_p4 }
   0xf   :  { %p2171_p7 = pnand %p2170_p6, %p2164_p3 }
  0x11   :  { %2174 = shalt.err (!%p2171_p7)
}
  0x12   :  { %s2250_s28 = smov 128   ;;  %s2251_s29 = smov 8  }
  0x13   :  { %28 = dma.hbm_to_vmem [thread:$0]  %s2440_s1, 256, %s23_s19, [#allocation3], %s2250_s28, %s2250_s28, %s2251_s29  }
  0x14   :  { %s2252_s7 = smov [#allocation5]   ;;  %s2175_s11 = scalar_lea.hbm %s2441_s2, 256 }
  0x15   :  { %s34_s8 = sshll.u32 %s2252_s7, 4  ;;  %p2176_p8 = scmp.ne.s32.totalorder %s2441_s2, %s2175_s11  ;;  %s35_s8 = int_to_ptr.vmem [resolvable:$true] %s34_s8 }
  0x16   :  { %p2179_p9 = scmp.lt.u32.totalorder %s2175_s11, %s2441_s2 }
  0x18   :  { %p2181_p10 = pnand %p2179_p9, %p2176_p8 }
  0x1a   :  { %2184 = shalt.err (!%p2181_p10)
}
  0x1b   :  { %s2185_s16 = scalar_lea.vmem %s35_s8, 256  ;;  %p2190_p12 = scmp.lt.s32.totalorder %s35_s8, %s35_s8 }
  0x1c   :  { %p2186_p11 = scmp.ne.s32.totalorder %s35_s8, %s2185_s16  ;;  %p2191_p13 = scmp.lt.s32.totalorder %s2185_s16, %s2185_s16 }
  0x1e   :  { %p2192_p0 = por %p2191_p13, %p2190_p12 }
  0x20   :  { %p2193_p1 = pnand %p2192_p0, %p2186_p11 }
  0x22   :  { %2196 = shalt.err (!%p2193_p1)
}
  0x23   :  { %40 = dma.hbm_to_vmem [thread:$0]  %s2441_s2, 256, %s35_s8, [#allocation6], %s2250_s28, %s2250_s28, %s2251_s29  }
  0x24   :  { %2241 = dma.done.wait [#allocation3], 256  }
  0x25   :  { %2242 = vsyncadd [#allocation3], 4294967040 }
  0x26   :  { %2243 = dma.done.wait [#allocation6], 256  }
  0x27   :  { %2244 = vsyncadd [#allocation6], 4294967040  ;;  %v2253_v0 = vmov 0.0   ;;  %vm2254_vm0 = vmmov 0   ;;  %vm57_vm1 = vcmask 261120   ;;  %v51_v1 = vld [vmem:[#allocation2] sm:$0xff] }
  0x28   :  { %1975 = vmatprep.subr.mxu0 %v2253_v0  ;;  %2005 = vmatprep.subr.mxu1 %v2253_v0  ;;  %v52_v2 = vld [vmem:[#allocation2 + $0x8] sm:$0xff]  ;;  %v49_v3 = vld [vmem:[%s2439_s0] sm:$0x1]  ;;  %v62_v4 = vsel %vm57_vm1, %v51_v1, 0  ;;  %v50_v7 = vld [vmem:[%s2439_s0 + $0x1] sm:$0x1] }
  0x29   :  { %1977 = vmatprep.mubr.msk.f32.mxu0 %vm2254_vm0, %v2253_v0  ;;  %2007 = vmatprep.mubr.msk.f32.mxu1 %vm2254_vm0, %v2253_v0  ;;  %v514_v5 = vsel %vm57_vm1, %v52_v2, 0  ;;  %v59_v6 = vsel %vm57_vm1, %v49_v3, 0  ;;  %v65_v8 = vand.u32 4294901760, %v62_v4  ;;  %v511_v11 = vsel %vm57_vm1, %v50_v7, 0  ;;  %v55_v29 = vld [vmem:[%s2442_s3] sm:$0x1] }
  0x2a   :  { %v517_v9 = vand.u32 4294901760, %v514_v5  ;;  %v130_v10 = vand.u32 4294901760, %v59_v6  ;;  %v582_v12 = vand.u32 4294901760, %v511_v11  ;;  %v56_v30 = vld [vmem:[%s2442_s3 + $0x1] sm:$0x1]  ;;  %vm962_vm2 = vcmp.lt.f32.partialorder %v55_v29, 0.0 }
  0x2b   :  { %1976 = vmatpush3.xpose.msra.mxu0 %v65_v8  ;;  %v142_v13 = vsub.f32 %v62_v4, %v65_v8  ;;  %vm966_vm3 = vcmask 57344   ;;  %vm963_vm4 = vcmp.lt.f32.partialorder %v56_v30, 0.0  ;;  %v53_v49 = vld [vmem:[#allocation5] sm:$0xff]  ;;  %v54_v51 = vld [vmem:[#allocation5 + $0x8] sm:$0xff]  ;;  %vm989_vm5 = vcmask 64512   ;;  %s2255_s3 = smov [#allocation8]  }
  0x2c   :  { %2006 = vmatpush3.xpose.msra.mxu1 %v517_v9  ;;  %v594_v14 = vsub.f32 %v514_v5, %v517_v9  ;;  %v131_v15 = vsub.f32 %v59_v6, %v130_v10  ;;  %1980 = vmatprep.subr.mxu0 %v2253_v0  ;;  %v583_v16 = vsub.f32 %v511_v11, %v582_v12  ;;  %v2371_v50 = vand.u32 4294901760, %v53_v49  ;;  %s1910_s24 = sshll.u32 %s2255_s3, 4  ;;  %s1911_s24 = int_to_ptr.vmem [resolvable:$true] %s1910_s24 }
  0x2d   :  { %2010 = vmatprep.subr.mxu1 %v2253_v0  ;;  %v143_v18 = vand.u32 4294901760, %v142_v13  ;;  %v2375_v52 = vand.u32 4294901760, %v54_v51  ;;  %s2197_s25 = scalar_lea.vmem %s1911_s24, 32  ;;  %p2202_p3 = scmp.lt.s32.totalorder %s1911_s24, %s1911_s24 }
  0x2e   :  { %v132_v17 = vand.u32 4294901760, %v131_v15  ;;  %v595_v19 = vand.u32 4294901760, %v594_v14  ;;  %v584_v20 = vand.u32 4294901760, %v583_v16  ;;  %v1071_v55 = vsub.f32 %v53_v49, %v2371_v50  ;;  %p2198_p2 = scmp.ne.s32.totalorder %s1911_s24, %s2197_s25  ;;  %p2203_p4 = scmp.lt.s32.totalorder %s2197_s25, %s2197_s25 }
  0x2f   :  { %v144_v22 = vsub.f32 %v142_v13, %v143_v18  ;;  %v1520_v59 = vsub.f32 %v54_v51, %v2375_v52 }
  0x30   :  { %v133_v21 = vsub.f32 %v131_v15, %v132_v17  ;;  %v596_v23 = vsub.f32 %v594_v14, %v595_v19  ;;  %v585_v24 = vsub.f32 %v583_v16, %v584_v20  ;;  %v1072_v60 = vand.u32 4294901760, %v1071_v55  ;;  %p2204_p5 = por %p2203_p4, %p2202_p3 }
  0x31   :  { %v145_v26 = vand.u32 4294901760, %v144_v22  ;;  %v1521_v4 = vand.u32 4294901760, %v1520_v59 }
  0x32   :  { %v134_v25 = vand.u32 4294901760, %v133_v21  ;;  %v597_v27 = vand.u32 4294901760, %v596_v23  ;;  %v586_v28 = vand.u32 4294901760, %v585_v24  ;;  %v1073_v3 = vsub.f32 %v1071_v55, %v1072_v60  ;;  %p2205_p6 = pnand %p2204_p5, %p2198_p2 }
  0x34   :  { %1978 = vmatmul.mubr.f32.vlgmr.msra.gmra.mrb[0].mxu0 %v134_v25  ;;  %2008 = vmatmul.mubr.f32.vlgmr.msra.gmra.mrb[0].mxu1 %v586_v28 }
  0x35   :  { %1981 = vmatpush3.xpose.msra.mxu0 %v145_v26  ;;  %2011 = vmatpush3.xpose.msra.mxu1 %v597_v27 }
  0x36   :  { %1982 = vmatprep.mubr.msk.f32.mxu0 %vm2254_vm0, %v2253_v0  ;;  %1985 = vmatprep.subr.mxu0 %v2253_v0 }
  0x37   :  { %2012 = vmatprep.mubr.msk.f32.mxu1 %vm2254_vm0, %v2253_v0  ;;  %2015 = vmatprep.subr.mxu1 %v2253_v0 }
  0x3c   :  { %1983 = vmatmul.mubr.f32.vlgmr.msra.gmra.mrb[0].mxu0 %v130_v10  ;;  %2013 = vmatmul.mubr.f32.vlgmr.msra.gmra.mrb[0].mxu1 %v582_v12 }
  0x3d   :  { %1986 = vmatpush3.xpose.msra.mxu0 %v142_v13  ;;  %2016 = vmatpush3.xpose.msra.mxu1 %v594_v14 }
  0x3e   :  { %1987 = vmatprep.mubr.msk.f32.mxu0 %vm2254_vm0, %v2253_v0  ;;  %1990 = vmatprep.subr.mxu0 %v2253_v0 }
  0x3f   :  { %2017 = vmatprep.mubr.msk.f32.mxu1 %vm2254_vm0, %v2253_v0  ;;  %2020 = vmatprep.subr.mxu1 %v2253_v0 }
  0x44   :  { %1988 = vmatmul.mubr.f32.vlgmr.msra.gmra.mrb[0].mxu0 %v131_v15  ;;  %2018 = vmatmul.mubr.f32.vlgmr.msra.gmra.mrb[0].mxu1 %v583_v16 }
  0x45   :  { %1991 = vmatpush3.xpose.msra.mxu0 %v65_v8  ;;  %2021 = vmatpush3.xpose.msra.mxu1 %v517_v9 }
  0x46   :  { %1992 = vmatprep.mubr.msk.f32.mxu0 %vm2254_vm0, %v2253_v0  ;;  %1995 = vmatprep.subr.mxu0 %v2253_v0 }
  0x47   :  { %2022 = vmatprep.mubr.msk.f32.mxu1 %vm2254_vm0, %v2253_v0  ;;  %2025 = vmatprep.subr.mxu1 %v2253_v0 }
  0x4c   :  { %1993 = vmatmul.mubr.f32.vlgmr.msra.gmra.mrb[0].mxu0 %v132_v17  ;;  %2023 = vmatmul.mubr.f32.vlgmr.msra.gmra.mrb[0].mxu1 %v584_v20 }
  0x4d   :  { %1996 = vmatpush3.xpose.msra.mxu0 %v143_v18  ;;  %2026 = vmatpush3.xpose.msra.mxu1 %v595_v19 }
  0x4e   :  { %1997 = vmatprep.mubr.msk.f32.mxu0 %vm2254_vm0, %v2253_v0  ;;  %2000 = vmatprep.subr.mxu0 %v2253_v0 }
  0x4f   :  { %2027 = vmatprep.mubr.msk.f32.mxu1 %vm2254_vm0, %v2253_v0  ;;  %2030 = vmatprep.subr.mxu1 %v2253_v0 }
  0x54   :  { %1998 = vmatmul.mubr.f32.vlgmr.msra.gmra.mrb[0].mxu0 %v130_v10  ;;  %2028 = vmatmul.mubr.f32.vlgmr.msra.gmra.mrb[0].mxu1 %v582_v12 }
  0x55   :  { %2001 = vmatpush3.xpose.msra.mxu0 %v65_v8  ;;  %2031 = vmatpush3.xpose.msra.mxu1 %v517_v9  ;;  %v1074_v9 = vand.u32 4294901760, %v1073_v3 }
  0x56   :  { %2002 = vmatprep.mubr.msk.f32.mxu0 %vm2254_vm0, %v2253_v0  ;;  %2032 = vmatprep.mubr.msk.f32.mxu1 %vm2254_vm0, %v2253_v0 }
  0x57   :  { %2035 = vmatprep.subr.mxu0 %v2253_v0  ;;  %2065 = vmatprep.subr.mxu1 %v2253_v0 }
  0x5c   :  { %2003 = vmatmul.mubr.f32.vlgmr.msra.gmra.mrb[0].mxu0 %v130_v10  ;;  %2033 = vmatmul.mubr.f32.vlgmr.msra.gmra.mrb[0].mxu1 %v582_v12  ;;  %v1522_v10 = vsub.f32 %v1520_v59, %v1521_v4 }
  0x5d   :  { %2037 = vmatprep.mubr.msk.f32.mxu0 %vm2254_vm0, %v2253_v0  ;;  %2067 = vmatprep.mubr.msk.f32.mxu1 %vm2254_vm0, %v2253_v0 }
  0x5e   :  { %2036 = vmatpush3.msra.mxu0 %v2371_v50  ;;  %2066 = vmatpush3.msra.mxu1 %v2375_v52  ;;  %v1523_v14 = vand.u32 4294901760, %v1522_v10 }
  0x5f   :  { %2040 = vmatprep.subr.mxu0 %v2253_v0  ;;  %2070 = vmatprep.subr.mxu1 %v2253_v0 }
 0x12f   :  { %v506_v31 = vpop.f32.mrb[0].mxu0  ;;  %v958_v32 = vpop.f32.mrb[0].mxu1 }
 0x130   :  { %v2004_v33 = vpop.f32.mrb[1].mxu0  ;;  %v964_v34 = vsel %vm962_vm2, %v55_v29, %v506_v31  ;;  %v2034_v35 = vpop.f32.mrb[1].mxu1  ;;  %v965_v37 = vsel %vm963_vm4, %v56_v30, %v958_v32 }
 0x131   :  { %v967_v36 = vsel %vm966_vm3, %v964_v34, -inf  ;;  %v970_v38 = vsel %vm966_vm3, %v965_v37, -inf }
 0x132   :  { %968 = vmax.xlane.f32.xlu0 %v967_v36 }
 0x136   :  { %971 = vmax.xlane.f32.xlu0 %v970_v38 }
 0x1bf   :  { %v969_v39 = vpop.xlane.xlu0 %968 }
 0x1c0   :  { %v973_v40 = vsub.f32 %v964_v34, %v969_v39 }
 0x1c2   :  { %v975_v41 = vmul.f32 1.442695, %v973_v40 }
 0x1c3   :  { %v972_v42 = vpop.xlane.xlu0 %971 }
 0x1c4   :  { %2145 = vpow2.f32 %v975_v41  ;;  %v974_v43 = vsub.f32 %v965_v37, %v972_v42 }
 0x1c6   :  { %v977_v44 = vmul.f32 1.442695, %v974_v43 }
 0x1c8   :  { %2147 = vpow2.f32 %v977_v44 }
 0x1ce   :  { %v2146_v45 = vpop.eup %2145 }
 0x1cf   :  { %v979_v46 = vsel %vm966_vm3, %v2146_v45, 0.0 }
 0x1d0   :  { %980 = vadd.xlane.f32.xlu1 %v979_v46 }
 0x1d2   :  { %v2148_v47 = vpop.eup %2147 }
 0x1d3   :  { %v982_v48 = vsel %vm966_vm3, %v2148_v47, 0.0 }
 0x1d4   :  { %983 = vadd.xlane.f32.xlu1 %v982_v48 }
 0x25d   :  { %v981_v53 = vpop.xlane.xlu1 %980 }
 0x25e   :  { %2149 = vrcp.f32 %v981_v53 }
 0x261   :  { %v984_v54 = vpop.xlane.xlu1 %983 }
 0x262   :  { %2151 = vrcp.f32 %v984_v54 }
 0x268   :  { %v2150_v56 = vpop.eup %2149 }
 0x269   :  { %v986_v57 = vmul.f32 %v2150_v56, %v2146_v45 }
 0x26b   :  { %1891 = vst.msk [vmem:[#allocation8] sm:$0x1] %vm966_vm3, %v986_v57  ;;  %v991_v58 = vsel %vm989_vm5, %v986_v57, 0 }
 0x26c   :  { %v2152_v61 = vpop.eup %2151  ;;  %v1059_v62 = vand.u32 4294901760, %v991_v58 }
 0x26d   :  { %v988_v63 = vmul.f32 %v2152_v61, %v2148_v47 }
 0x26e   :  { %v1060_v1 = vsub.f32 %v991_v58, %v1059_v62 }
 0x26f   :  { %v1440_v2 = vsel %vm989_vm5, %v988_v63, 0  ;;  %1892 = vst.msk [vmem:[#allocation8 + $0x1] sm:$0x1] %vm966_vm3, %v988_v63 }
 0x270   :  { %v1508_v5 = vand.u32 4294901760, %v1440_v2  ;;  %v1061_v6 = vand.u32 4294901760, %v1060_v1 }
 0x272   :  { %v1062_v7 = vsub.f32 %v1060_v1, %v1061_v6  ;;  %v1509_v8 = vsub.f32 %v1440_v2, %v1508_v5 }
 0x274   :  { %v1063_v11 = vand.u32 4294901760, %v1062_v7  ;;  %v1510_v12 = vand.u32 4294901760, %v1509_v8 }
 0x276   :  { %2038 = vmatmul.mubr.f32.vlgmr.msra.gmra.mrb[2].mxu0 %v1063_v11  ;;  %v1511_v13 = vsub.f32 %v1509_v8, %v1510_v12 }
 0x277   :  { %2041 = vmatpush3.msra.mxu0 %v1074_v9  ;;  %2042 = vmatprep.mubr.msk.f32.mxu0 %vm2254_vm0, %v2253_v0 }
 0x278   :  { %v1512_v15 = vand.u32 4294901760, %v1511_v13  ;;  %2045 = vmatprep.subr.mxu0 %v2253_v0 }
 0x27a   :  { %2068 = vmatmul.mubr.f32.vlgmr.msra.gmra.mrb[2].mxu1 %v1512_v15 }
 0x27b   :  { %2071 = vmatpush3.msra.mxu1 %v1523_v14  ;;  %2072 = vmatprep.mubr.msk.f32.mxu1 %vm2254_vm0, %v2253_v0 }
 0x27c   :  { %2075 = vmatprep.subr.mxu1 %v2253_v0 }
 0x27e   :  { %2043 = vmatmul.mubr.f32.vlgmr.msra.gmra.mrb[2].mxu0 %v1059_v62 }
 0x27f   :  { %2046 = vmatpush3.msra.mxu0 %v1071_v55  ;;  %2047 = vmatprep.mubr.msk.f32.mxu0 %vm2254_vm0, %v2253_v0 }
 0x280   :  { %2050 = vmatprep.subr.mxu0 %v2253_v0 }
 0x282   :  { %2073 = vmatmul.mubr.f32.vlgmr.msra.gmra.mrb[2].mxu1 %v1508_v5 }
 0x283   :  { %2076 = vmatpush3.msra.mxu1 %v1520_v59  ;;  %2077 = vmatprep.mubr.msk.f32.mxu1 %vm2254_vm0, %v2253_v0 }
 0x284   :  { %2080 = vmatprep.subr.mxu1 %v2253_v0 }
 0x286   :  { %2048 = vmatmul.mubr.f32.vlgmr.msra.gmra.mrb[2].mxu0 %v1060_v1 }
 0x287   :  { %2051 = vmatpush3.msra.mxu0 %v2371_v50  ;;  %2052 = vmatprep.mubr.msk.f32.mxu0 %vm2254_vm0, %v2253_v0 }
 0x288   :  { %2055 = vmatprep.subr.mxu0 %v2253_v0 }
 0x28a   :  { %2078 = vmatmul.mubr.f32.vlgmr.msra.gmra.mrb[2].mxu1 %v1509_v8 }
 0x28b   :  { %2081 = vmatpush3.msra.mxu1 %v2375_v52  ;;  %2082 = vmatprep.mubr.msk.f32.mxu1 %vm2254_vm0, %v2253_v0 }
 0x28c   :  { %2085 = vmatprep.subr.mxu1 %v2253_v0 }
 0x28e   :  { %2053 = vmatmul.mubr.f32.vlgmr.msra.gmra.mrb[2].mxu0 %v1061_v6 }
 0x28f   :  { %2056 = vmatpush3.msra.mxu0 %v1072_v60  ;;  %2057 = vmatprep.mubr.msk.f32.mxu0 %vm2254_vm0, %v2253_v0 }
 0x290   :  { %2060 = vmatprep.subr.mxu0 %v2253_v0 }
 0x292   :  { %2083 = vmatmul.mubr.f32.vlgmr.msra.gmra.mrb[2].mxu1 %v1510_v12 }
 0x293   :  { %2086 = vmatpush3.msra.mxu1 %v1521_v4  ;;  %2087 = vmatprep.mubr.msk.f32.mxu1 %vm2254_vm0, %v2253_v0 }
 0x294   :  { %2090 = vmatprep.subr.mxu1 %v2253_v0 }
 0x296   :  { %2058 = vmatmul.mubr.f32.vlgmr.msra.gmra.mrb[2].mxu0 %v1059_v62 }
 0x297   :  { %2061 = vmatpush3.msra.mxu0 %v2371_v50  ;;  %2062 = vmatprep.mubr.msk.f32.mxu0 %vm2254_vm0, %v2253_v0 }
 0x29a   :  { %2088 = vmatmul.mubr.f32.vlgmr.msra.gmra.mrb[2].mxu1 %v1508_v5 }
 0x29b   :  { %2091 = vmatpush3.msra.mxu1 %v2375_v52  ;;  %2092 = vmatprep.mubr.msk.f32.mxu1 %vm2254_vm0, %v2253_v0 }
 0x29e   :  { %2063 = vmatmul.mubr.f32.vlgmr.msra.gmra.mrb[2].mxu0 %v1059_v62 }
 0x2a2   :  { %2093 = vmatmul.mubr.f32.vlgmr.msra.gmra.mrb[2].mxu1 %v1508_v5 }
 0x2a3   :  { %2208 = shalt.err (!%p2205_p6)
}
 0x2a4   :  { %s2209_s28 = scalar_lea.hbm %s2444_s5, 32 }
 0x2a5   :  { %p2210_p7 = scmp.ne.s32.totalorder %s2444_s5, %s2209_s28  ;;  %p2213_p8 = scmp.lt.u32.totalorder %s2209_s28, %s2444_s5 }
 0x2a7   :  { %p2215_p9 = pnand %p2213_p8, %p2210_p7 }
 0x2a9   :  { %2218 = shalt.err (!%p2215_p9)
}
 0x2aa   :  { %s2256_s8 = smov 16   ;;  %s2257_s9 = smov 1   ;;  %vm1888_vm6 = vcmask 253952  }
 0x2ab   :  { %1916 = dma.vmem_to_hbm [thread:$0]  %s1911_s24, 32, %s2444_s5, [#allocation9], %s2256_s8, %s2256_s8, %s2257_s9  }
 0x2ac   :  { %s2258_s12 = smov [#allocation7]  }
 0x2ad   :  { %s1898_s13 = sshll.u32 %s2258_s12, 4  ;;  %s1899_s13 = int_to_ptr.vmem [resolvable:$true] %s1898_s13 }
 0x2ae   :  { %s2219_s14 = scalar_lea.vmem %s1899_s13, 32  ;;  %p2224_p11 = scmp.lt.s32.totalorder %s1899_s13, %s1899_s13 }
 0x2af   :  { %p2220_p10 = scmp.ne.s32.totalorder %s1899_s13, %s2219_s14  ;;  %p2225_p12 = scmp.lt.s32.totalorder %s2219_s14, %s2219_s14 }
 0x2b1   :  { %p2226_p13 = por %p2225_p12, %p2224_p11 }
 0x2b3   :  { %p2227_p0 = pnand %p2226_p13, %p2220_p10 }
 0x371   :  { %v1435_v0 = vpop.f32.mrb[2].mxu0 }
 0x372   :  { %1889 = vst.msk [vmem:[#allocation7] sm:$0x1] %vm1888_vm6, %v1435_v0  ;;  %v2064_v16 = vpop.f32.mrb[3].mxu0 }
 0x375   :  { %v1884_v17 = vpop.f32.mrb[2].mxu1 }
 0x376   :  { %1890 = vst.msk [vmem:[#allocation7 + $0x1] sm:$0x1] %vm1888_vm6, %v1884_v17  ;;  %v2094_v18 = vpop.f32.mrb[3].mxu1 }
 0x377   :  { %2230 = shalt.err (!%p2227_p0)
}
 0x378   :  { %s2231_s5 = scalar_lea.hbm %s2443_s4, 32 }
 0x379   :  { %p2232_p1 = scmp.ne.s32.totalorder %s2443_s4, %s2231_s5  ;;  %p2235_p2 = scmp.lt.u32.totalorder %s2231_s5, %s2443_s4 }
 0x37b   :  { %p2237_p3 = pnand %p2235_p2, %p2232_p1 }
 0x37d   :  { %2240 = shalt.err (!%p2237_p3)
}
 0x37e   :  { %1904 = dma.vmem_to_hbm [thread:$0]  %s1899_s13, 32, %s2443_s4, [#allocation4], %s2256_s8, %s2256_s8, %s2257_s9  }
 0x37f   :  { %2245 = dma.done.wait [#allocation4], 32  }
 0x380   :  { %2246 = vsyncadd [#allocation4], 4294967264 }
 0x381   :  { %2247 = dma.done.wait [#allocation9], 32  }
 0x382   :  { %2248 = vsyncadd [#allocation9], 4294967264 }
 0x383   :  { %1923 = vsyncpa [#allocation3], 1 }
 0x384   :  { %1924 = vsyncpa [#allocation6], 1 }
 0x385   :  { %1925 = vsyncpa [#allocation4], 1 }
 0x386   :  { %1926 = vsyncpa [#allocation9], 1 }

</bundles_post_ra>
